<compile_context>
chip_gen: v7x
topology: tpu7x:2x2x1
jax: 0.10.0
libtpu: 0.0.40
codegen_flags: <defaults>
</compile_context>

<pallas_src>
import functools
import numpy as np

import jax
import jax.numpy as jnp
from jax import lax
from jax.experimental import pallas as pl
from jax.experimental.pallas import tpu as pltpu


_MAX_TILE_ROWS = 1024          # up to 1024 x 512 x f32 = 2 MiB per input tile
_PREF_COLS = (512, 256, 128)   # preferred lane-dense last dims


def _round_up(a, b):
    return (a + b - 1) // b * b


# ----------------------------------------------------------------------------
# Elementwise-difference full-reduction kernels (MSE / L1 / PSNR-else)
# ----------------------------------------------------------------------------
@functools.lru_cache(maxsize=None)
def _build_reduce_fn(kind, shape, dtype_name, itemsize):
    """Jitted (x, y) -> scalar mean reduction, cached per (kind, shape, dtype)."""
    del dtype_name  # only part of the cache key
    shape = tuple(int(s) for s in shape)
    n = 1
    for s in shape:
        n *= s
    n = max(n, 1)

    # Zero-copy 2-D lane-dense view of the flattened input (no jnp.pad).
    cols = None
    for c in _PREF_COLS:
        if n % c == 0:
            cols = c
            break
    if cols is None:
        # Fallback: keep the original trailing dim (always divides n); still
        # zero-copy, just less lane-dense.  Rare for image-sized tensors.
        cols = shape[-1] if (len(shape) >= 1 and shape[-1] > 0) else 1
    rows = n // cols

    tile_rows = rows if rows <= _MAX_TILE_ROWS else _MAX_TILE_ROWS
    nblocks = -(-rows // tile_rows)
    num_par = 2 if nblocks >= 2 else 1       # shard across both TCs on v7x
    chunks = -(-nblocks // num_par)
    needs_mask = (rows % tile_rows != 0) or (num_par * chunks != nblocks)
    last_block = nblocks - 1
    inv_n = 1.0 / float(n)

    if num_par * chunks == nblocks:
        def in_map(p, c):
            return (p * chunks + c, 0)
    else:
        def in_map(p, c):
            # Clamp phantom trailing blocks onto the last real block; their
            # contribution is zeroed by the in-kernel row mask.
            return (jnp.minimum(p * chunks + c, last_block), 0)

    def kernel(x_ref, y_ref, o_ref, acc_ref):
        c = pl.program_id(1)

        @pl.when(c == 0)
        def _init():
            acc_ref[...] = jnp.zeros_like(acc_ref)

        d = x_ref[...].astype(jnp.float32) - y_ref[...].astype(jnp.float32)
        val = d * d if kind == "mse" else jnp.abs(d)
        if needs_mask:
            base = (pl.program_id(0) * chunks + c) * tile_rows
            row_ids = lax.broadcasted_iota(jnp.int32, (tile_rows, cols), 0)
            # select (not multiply): OOB rows of a partial block are undefined.
            val = jnp.where(row_ids < (rows - base), val, 0.0)
        acc_ref[...] += jnp.sum(val, axis=0, keepdims=True)   # lane-wide partial

        @pl.when(c == chunks - 1)
        def _finalize():
            o_ref[...] = jnp.sum(acc_ref[...], keepdims=True)

    tile_bytes = tile_rows * cols * itemsize
    vmem_limit = int(min(64 << 20, max(32 << 20, 6 * tile_bytes + (2 << 20))))

    call = pl.pallas_call(
        kernel,
        out_shape=jax.ShapeDtypeStruct((num_par, 1), jnp.float32),
        grid=(num_par, chunks),
        in_specs=[
            pl.BlockSpec((tile_rows, cols), in_map),
            pl.BlockSpec((tile_rows, cols), in_map),
        ],
        out_specs=pl.BlockSpec((1, 1), lambda p, c: (p, 0)),
        scratch_shapes=[pltpu.VMEM((1, cols), jnp.float32)],
        compiler_params=pltpu.CompilerParams(
            dimension_semantics=("parallel", "arbitrary"),
            vmem_limit_bytes=vmem_limit,
        ),
        cost_estimate=pl.CostEstimate(
            flops=3 * rows * cols,
            transcendentals=0,
            bytes_accessed=2 * rows * cols * itemsize + 8 * num_par,
        ),
    )

    def fn(x, y):
        # Free, contiguous reshapes -- no padding / extra HBM pass.
        x2 = x.reshape(rows, cols)
        y2 = y.reshape(rows, cols)
        partials = call(x2, y2)              # (num_par, 1) f32
        return jnp.sum(partials) * inv_n

    return jax.jit(fn)


def _reduce_pair(kind, x, y):
    x = jnp.asarray(x)
    y = jnp.asarray(y)
    assert x.shape == y.shape, (x.shape, y.shape)
    dt = jnp.promote_types(x.dtype, y.dtype)   # keep native width (e.g. bf16)
    x = x.astype(dt)
    y = y.astype(dt)
    ndt = np.dtype(dt)
    fn = _build_reduce_fn(kind, tuple(int(s) for s in x.shape),
                          ndt.name, int(ndt.itemsize))
    return fn(x, y)


def mse_loss(x, y):
    return _reduce_pair("mse", x, y)


def l1_loss(x, y):
    return _reduce_pair("l1", x, y)


# ----------------------------------------------------------------------------
# Blur loss: separable LoG convolution + per-batch log-energy
# ----------------------------------------------------------------------------
def gen_log_kernel(sigma, size):
    """Deterministic LoG kernel, identical to Blur.gen_LoG_kernel."""
    X = np.arange(size // 2, -size // 2, -1)
    Y = np.arange(size // 2, -size // 2, -1)
    xx, yy = np.meshgrid(X, Y)
    log_k = (1.0 / (np.pi * sigma ** 4)
             * (1.0 - (xx ** 2 + yy ** 2) / (2.0 * sigma ** 2))
             * np.exp(-(xx ** 2 + yy ** 2) / (2.0 * sigma ** 2)))
    return log_k.astype(np.float32)  # (size, size)


class BlurPallas:
    """Pallas equivalent of Blur(sigma, size, beta=0.25)."""

    def __init__(self, sigma, size, beta=0.25):
        self.size = int(size)
        self.beta = float(beta)
        sigma = float(sigma)
        # Exact rank-2 (separable) factorization of the sampled LoG kernel:
        #   K[i, j] = v[i]*u[j] + u[i]*v[j]
        X = np.arange(self.size // 2, -self.size // 2, -1).astype(np.float64)
        E = np.exp(-(X ** 2) / (2.0 * sigma ** 2))
        C = 1.0 / (np.pi * sigma ** 4)
        u = E
        v = C * (0.5 - X ** 2 / (2.0 * sigma ** 2)) * E
        k2d = np.outer(v, u) + np.outer(u, v)
        assert np.allclose(k2d, gen_log_kernel(sigma, self.size),
                           rtol=1e-5, atol=1e-8)
        self.u = tuple(float(t) for t in u)
        self.v = tuple(float(t) for t in v)
        self._cache = {}

    def __call__(self, img, _=None):
        img = jnp.asarray(img)
        key = (tuple(int(s) for s in img.shape), img.dtype.name)
        fn = self._cache.get(key)
        if fn is None:
            fn = self._build(key[0], img.dtype)
            self._cache[key] = fn
        return fn(img)

    def _build(self, shape, dtype):
        B, C, H, W = shape
        assert C == 1, "Blur's LoG weight is (1,1,k,k) with groups=1 -> C must be 1"
        ks = self.size
        pad = ks // 2
        # One-sided zero padding is enough: image at offset (0,0); rolls that
        # wrap always land in the zero strips on the right / bottom.
        Hp = _round_up(H + pad, 8)        # sublane-aligned
        Wp = _round_up(W + pad, 128)      # lane-aligned
        u, v = self.u, self.v
        hw = float(H * W)
        inv_hw = 1.0 / hw
        itemsize = np.dtype(dtype).itemsize

        def kernel(img_ref, o_ref, buf_ref):
            # In-kernel zero padding (no host-side jnp.pad / extra HBM pass).
            buf_ref[...] = jnp.zeros_like(buf_ref)
            buf_ref[0:H, 0:W] = img_ref[...].astype(jnp.float32)
            P = buf_ref[...]                                   # (Hp, Wp)

            # Row (lane) pass: two horizontal ks-tap 1-D convs sharing the
            # same XLU lane rolls of P (u and v are symmetric, so the roll
            # direction convention cannot change the result).
            A = None
            Bm = None
            for j in range(ks):
                s = (pad - j) % Wp
                Pj = P if s == 0 else pltpu.roll(P, shift=s, axis=1)
                A = u[j] * Pj if A is None else A + u[j] * Pj
                Bm = v[j] * Pj if Bm is None else Bm + v[j] * Pj

            # Column (sublane) pass: two vertical ks-tap 1-D convs via rolls.
            lap = None
            for i in range(ks):
                s = (pad - i) % Hp
                Ai = A if s == 0 else pltpu.roll(A, shift=s, axis=0)
                Bi = Bm if s == 0 else pltpu.roll(Bm, shift=s, axis=0)
                term = v[i] * Ai + u[i] * Bi
                lap = term if lap is None else lap + term

            # Only rows < H and cols < W are real 'same'-conv output pixels.
            row_ids = lax.broadcasted_iota(jnp.int32, (Hp, Wp), 0)
            col_ids = lax.broadcasted_iota(jnp.int32, (Hp, Wp), 1)
            valid = jnp.logical_and(row_ids < H, col_ids < W)
            lap_sq = jnp.where(valid, lap * lap, 0.0)
            s_lap = jnp.sum(lap_sq, keepdims=True)             # (1, 1)

            # All padding is zero, so sum(P) == sum(image).
            mean_img = jnp.sum(P, keepdims=True) * inv_hw      # (1, 1)
            denom = hw - mean_img * mean_img   # literally H*W - mean(img)^2 (PyTorch spec)
            o_ref[...] = -jnp.log(s_lap / denom + 1e-8)        # per-batch value

        in_block_bytes = H * W * itemsize
        vmem_est = 2 * in_block_bytes + 10 * Hp * Wp * 4 + (1 << 20)
        # 128 MiB physical on v5e/v6e; large images on v7x need H-tiling (TODO).
        vmem_limit = int(min(100 << 20, max(32 << 20, vmem_est)))

        call = pl.pallas_call(
            kernel,
            out_shape=jax.ShapeDtypeStruct((B, 1), jnp.float32),
            grid=(B,),
            in_specs=[pl.BlockSpec((None, H, W), lambda b: (b, 0, 0))],
            out_specs=pl.BlockSpec((1, 1), lambda b: (b, 0)),
            scratch_shapes=[pltpu.VMEM((Hp, Wp), jnp.float32)],
            compiler_params=pltpu.CompilerParams(
                dimension_semantics=("parallel",),
                vmem_limit_bytes=vmem_limit,
            ),
            cost_estimate=pl.CostEstimate(
                flops=B * (8 * ks + 8) * Hp * Wp,
                transcendentals=B,
                bytes_accessed=B * H * W * itemsize + 4 * B,
            ),
        )

        scale = self.beta / float(B)

        def run(img):
            per_batch = call(img.reshape(B, H, W))   # (B, 1) f32
            return jnp.sum(per_batch) * scale        # == blur_loss.mean()*beta

        # TODO(synk): tile H inside the grid (strip + ks-1 halo, reduction axis
        # last) for large images -- required on v7x (64 MiB physical VMEM).
        return jax.jit(run)


# ----------------------------------------------------------------------------
# BlurMetric wrapper (mirrors the PyTorch module's dispatch)
# ----------------------------------------------------------------------------
class BlurMetric:
    def __init__(self, loss_fn='mse', device='cpu', alpha=0.8, _lambda=0.2,
                 beta=1.0, sigma=1.0, kernel_size=7):
        if loss_fn == 'mse':
            self.loss = mse_loss
        elif loss_fn == 'l1':
            self.loss = l1_loss
        elif loss_fn == 'blur':
            self.loss = BlurPallas(sigma, kernel_size)
        elif loss_fn in ('recon', 'ssim', 'sharp', 'smooth'):
            # TODO(synk): SSIM / Sharpness / Smoothness modes not ported to Pallas.
            raise NotImplementedError(f"loss_fn={loss_fn!r} not ported to Pallas")
        else:
            # PSNR-like branch: -10 * log(mse) / log(10); result has shape (1,)
            # exactly like torch.log(torch.Tensor([10.0])).
            self.loss = lambda x, y: (-10.0 * jnp.log(mse_loss(x, y))
                                      / jnp.log(jnp.array([10.0], jnp.float32)))

    def __call__(self, recon_image, image=None):
        return self.loss(recon_image, image)


# ----------------------------------------------------------------------------
# Demo
# ----------------------------------------------------------------------------
if __name__ == "__main__":
    key = jax.random.PRNGKey(0)
    k1, k2, k3 = jax.random.split(key, 3)

    # default mode: MSE between two (B, C, H, W) tensors
    x = jax.random.normal(k1, (2, 4, 16, 16), dtype=jnp.float32)
    y = jax.random.normal(k2, (2, 4, 16, 16), dtype=jnp.float32)
    metric_mse = BlurMetric()                    # loss_fn='mse' (default)
    out_mse = jax.block_until_ready(metric_mse(x, y))
    np.testing.assert_allclose(np.asarray(out_mse),
                               np.asarray(jnp.mean((x - y) ** 2)),
                               rtol=1e-4, atol=1e-5)

    # 'l1' mode exercises the same tiled reduction kernel
    metric_l1 = BlurMetric(loss_fn='l1')
    out_l1 = jax.block_until_ready(metric_l1(x, y))
    np.testing.assert_allclose(np.asarray(out_l1),
                               np.asarray(jnp.mean(jnp.abs(x - y))),
                               rtol=1e-4, atol=1e-5)

    # 'blur' mode: single-channel image, separable LoG conv + log-energy
    img = jax.nn.sigmoid(jax.random.normal(k3, (2, 1, 16, 16), dtype=jnp.float32))
    metric_blur = BlurMetric(loss_fn='blur', sigma=1.0, kernel_size=7)
    out_blur = jax.block_until_ready(metric_blur(img, None))

    # Pure-XLA reference of the Blur forward pass.
    k2d = jnp.asarray(gen_log_kernel(1.0, 7))[None, None]      # (1,1,7,7)
    lap_ref = lax.conv_general_dilated(
        img, k2d, (1, 1), 'SAME',
        dimension_numbers=('NCHW', 'OIHW', 'NCHW'),
        precision=lax.Precision.HIGHEST)
    ref_blur = jnp.mean(
        -jnp.log(jnp.sum(lap_ref ** 2, axis=(1, 2, 3))
                 / (16 * 16 - jnp.mean(img, axis=(1, 2, 3)) ** 2) + 1e-8)) * 0.25
    np.testing.assert_allclose(np.asarray(out_blur), np.asarray(ref_blur),
                               rtol=5e-3, atol=5e-3)

    print("KERNEL_OK")
</pallas_src>

<mosaic_0001>
module attributes {stable_mosaic.version = 11 : i64} {
  func.func @kernel(%arg0: i32, %arg1: i32, %arg2: memref<4x512xf32, #tpu.memory_space<vmem>>, %arg3: memref<4x512xf32, #tpu.memory_space<vmem>>, %arg4: memref<1x1xf32, #tpu.memory_space<vmem>>, %arg5: memref<1x512xf32, #tpu.memory_space<vmem>>) attributes {dimension_semantics = [#tpu.dimension_semantics<parallel>, #tpu.dimension_semantics<arbitrary>], iteration_bounds = array<i64: 1, 1>, scalar_prefetch = 0 : i64, scratch_operands = 1 : i64, tpu.core_type = #tpu.core_type<tc>, window_params = [{transform_indices = @transform_0, window_bounds = array<i64: 4, 512>}, {transform_indices = @transform_1, window_bounds = array<i64: 4, 512>}, {transform_indices = @transform_2, window_bounds = array<i64: 1, 1>}]} {
    %c0_i32 = arith.constant 0 : i32
    %0 = arith.cmpi eq, %arg1, %c0_i32 : i32
    %1 = arith.extui %0 : i1 to i32
    %c0_i32_0 = arith.constant 0 : i32
    %2 = arith.cmpi ne, %1, %c0_i32_0 : i32
    scf.if %2 {
      %cst_10 = arith.constant 0.000000e+00 : f32
      %15 = vector.broadcast %cst_10 : f32 to vector<1x512xf32>
      %c0_11 = arith.constant 0 : index
      %c0_12 = arith.constant 0 : index
      %16 = vector.load %arg5[%c0_11, %c0_12] : memref<1x512xf32, #tpu.memory_space<vmem>>, vector<1x512xf32>
      tpu.vector_store %arg5[%c0_11, %c0_12], %15 {strides = array<i32>} : memref<1x512xf32, #tpu.memory_space<vmem>>, vector<1x512xf32>,
    } else {
    }
    %c0 = arith.constant 0 : index
    %c0_1 = arith.constant 0 : index
    %3 = vector.load %arg2[%c0, %c0_1] : memref<4x512xf32, #tpu.memory_space<vmem>>, vector<4x512xf32>
    %c0_2 = arith.constant 0 : index
    %c0_3 = arith.constant 0 : index
    %4 = vector.load %arg3[%c0_2, %c0_3] : memref<4x512xf32, #tpu.memory_space<vmem>>, vector<4x512xf32>
    %5 = arith.subf %3, %4 : vector<4x512xf32>
    %6 = arith.mulf %5, %5 : vector<4x512xf32>
    %c0_4 = arith.constant 0 : index
    %c0_5 = arith.constant 0 : index
    %7 = vector.load %arg5[%c0_4, %c0_5] : memref<1x512xf32, #tpu.memory_space<vmem>>, vector<1x512xf32>
    %cst = arith.constant dense<0.000000e+00> : vector<512xf32>
    %8 = vector.multi_reduction <add>, %6, %cst [0] : vector<4x512xf32> to vector<512xf32>
    %9 = vector.shape_cast %8 : vector<512xf32> to vector<1x512xf32>
    %10 = arith.addf %7, %9 : vector<1x512xf32>
    %c0_6 = arith.constant 0 : index
    %c0_7 = arith.constant 0 : index
    %11 = vector.load %arg5[%c0_6, %c0_7] : memref<1x512xf32, #tpu.memory_space<vmem>>, vector<1x512xf32>
    tpu.vector_store %arg5[%c0_6, %c0_7], %10 {strides = array<i32>} : memref<1x512xf32, #tpu.memory_space<vmem>>, vector<1x512xf32>,
    %c0_i32_8 = arith.constant 0 : i32
    %12 = arith.cmpi eq, %arg1, %c0_i32_8 : i32
    %13 = arith.extui %12 : i1 to i32
    %c0_i32_9 = arith.constant 0 : i32
    %14 = arith.cmpi ne, %13, %c0_i32_9 : i32
    scf.if %14 {
      %c0_10 = arith.constant 0 : index
      %c0_11 = arith.constant 0 : index
      %15 = vector.load %arg5[%c0_10, %c0_11] : memref<1x512xf32, #tpu.memory_space<vmem>>, vector<1x512xf32>
      %16 = vector.shape_cast %15 : vector<1x512xf32> to vector<1x1x512xf32>
      %cst_12 = arith.constant dense<0.000000e+00> : vector<1xf32>
      %17 = vector.multi_reduction <add>, %16, %cst_12 [1, 2] : vector<1x1x512xf32> to vector<1xf32>
      %18 = vector.shape_cast %17 : vector<1xf32> to vector<1x1x1xf32>
      %19 = vector.extract %18[0, 0, 0] : f32 from vector<1x1x1xf32>
      %20 = vector.broadcast %19 : f32 to vector<1x1xf32>
      %c0_13 = arith.constant 0 : index
      %c0_14 = arith.constant 0 : index
      %21 = vector.load %arg4[%c0_13, %c0_14] : memref<1x1xf32, #tpu.memory_space<vmem>>, vector<1x1xf32>
      tpu.vector_store %arg4[%c0_13, %c0_14], %20 {strides = array<i32>} : memref<1x1xf32, #tpu.memory_space<vmem>>, vector<1x1xf32>,
    } else {
    }
    return
  }
  func.func @transform_0(%arg0: i32, %arg1: i32) -> (i32, i32) {
    %c1_i32 = arith.constant 1 : i32
    %0 = arith.muli %arg0, %c1_i32 : i32
    %1 = arith.addi %0, %arg1 : i32
    %c0_i32 = arith.constant 0 : i32
    %c0_i32_0 = arith.constant 0 : i32
    return %1, %c0_i32 : i32, i32
  }
  func.func @transform_1(%arg0: i32, %arg1: i32) -> (i32, i32) {
    %c1_i32 = arith.constant 1 : i32
    %0 = arith.muli %arg0, %c1_i32 : i32
    %1 = arith.addi %0, %arg1 : i32
    %c0_i32 = arith.constant 0 : i32
    %c0_i32_0 = arith.constant 0 : i32
    return %1, %c0_i32 : i32, i32
  }
  func.func @transform_2(%arg0: i32, %arg1: i32) -> (i32, i32) {
    %c0_i32 = arith.constant 0 : i32
    %c0_i32_0 = arith.constant 0 : i32
    return %arg0, %c0_i32 : i32, i32
  }
}

</mosaic_0001>

<bundles_post_ra>
// kernel: fn.1
= control target key start
LH: loop header
LB: loop body
LE: loop exit
PB: predicated region body
PF: predicated region fallthrough
CT: control target
= control target key end

     0   :  { %v56_v0 = vlaneseq  ;;  %s290_s0 = inlined_call_operand.vmem [shape: f32[4,512], index: 0, kind: input, shape index: {}]   ;;  %s291_s1 = inlined_call_operand.vmem [shape: f32[4,512], index: 1, kind: input, shape index: {}]   ;;  %s292_s2 = inlined_call_operand.hbm [shape: f32[1,1], index: 2, kind: output, shape index: {}]  }
   0x1   :  { %v61_v1 = vld [vmem:[%s290_s0] sm:$0xff]  ;;  %v62_v2 = vld [vmem:[%s290_s0 + $0x8] sm:$0xff] }
   0x2   :  { %v63_v3 = vld [vmem:[%s291_s1] sm:$0xff]  ;;  %v64_v4 = vld [vmem:[%s291_s1 + $0x8] sm:$0xff] }
   0x3   :  { %v65_v5 = vsub.f32 %v61_v1, %v63_v3 }
   0x4   :  { %7 = vsyncpa [#allocation4], 0  ;;  %vm270_vm0 = vcmp.lt.s32.totalorder %v56_v0, 512  ;;  %v66_v7 = vsub.f32 %v62_v2, %v64_v4  ;;  %vm76_vm1 = vcmask 1043456   ;;  %v240_v8 = vmov 0.0   ;;  %s242_s0 = smov [#allocation3]  }
   0x5   :  { %60 = vst.msk [vmem:[#allocation2] sm:$0xf] %vm270_vm0, %v240_v8  ;;  %v67_v9 = vmul.f32 %v65_v5, %v65_v5  ;;  %v241_v25 = vmov 1966171168   ;;  %v115_v36 = vshrl.u32 %v56_v0, 7  ;;  %vm165_vm2 = vcmask 1040384  }
   0x6   :  { %v68_v10 = vmul.f32 %v66_v7, %v66_v7  ;;  %v112_v26 = vunpack.c.l.s4 %v241_v25  ;;  %s191_s1 = sshll.u32 %s242_s0, 4  ;;  %vm183_vm3 = vcmask 0   ;;  %s192_s1 = int_to_ptr.vmem [resolvable:$true] %s191_s1 }
   0x7   :  { %v72_v11 = vcombine.high %v67_v9, %v67_v9  ;;  %v77_v12 = vsel %vm76_vm1, %v67_v9, 0.0  ;;  %v147_v54 = vsub.s32 0, %v115_v36  ;;  %v151_v55 = vsub.s32 1, %v115_v36  ;;  %s216_s18 = scalar_lea.vmem %s192_s1, 16  ;;  %s220_s19 = scalar_lea.vmem %s192_s1, 32 }
   0x8   :  { %v73_v13 = vcombine.high %v68_v10, %v68_v10  ;;  %v78_v14 = vrot.slane %v77_v12, 4  ;;  %v91_v15 = vsel %vm76_vm1, %v68_v10, 0.0  ;;  %v113_v35 = vunpack.c.0.s8 %v112_v26  ;;  %p217_p0 = scmp.ne.s32.totalorder %s192_s1, %s216_s18  ;;  %p221_p1 = scmp.lt.s32.totalorder %s192_s1, %s192_s1 }
   0x9   :  { %v84_v16 = vsel %vm76_vm1, %v72_v11, 0.0  ;;  %v92_v17 = vrot.slane %v91_v15, 4  ;;  %v155_v56 = vsub.s32 2, %v115_v36  ;;  %v159_v57 = vsub.s32 3, %v115_v36  ;;  %p222_p2 = scmp.lt.s32.totalorder %s220_s19, %s216_s18 }
   0xa   :  { %v79_v18 = vadd.f32 %v78_v14, %v77_v12  ;;  %v85_v19 = vrot.slane %v84_v16, 4  ;;  %v98_v20 = vsel %vm76_vm1, %v73_v13, 0.0  ;;  %v116_v44 = vsub.s32 %v113_v35, %v115_v36 }
   0xb   :  { %v93_v21 = vadd.f32 %v92_v17, %v91_v15  ;;  %v99_v22 = vrot.slane %v98_v20, 4  ;;  %p223_p3 = por %p222_p2, %p221_p1 }
   0xc   :  { %v80_v23 = vrot.slane %v79_v18, 2  ;;  %v86_v24 = vadd.f32 %v85_v19, %v84_v16  ;;  %v69_v51 = vld [vmem:[#allocation2] sm:$0xf] }
   0xd   :  { %v94_v27 = vrot.slane %v93_v21, 2  ;;  %v100_v28 = vadd.f32 %v99_v22, %v98_v20  ;;  %p224_p4 = pnand %p223_p3, %p217_p0 }
   0xe   :  { %v81_v29 = vadd.f32 %v80_v23, %v79_v18  ;;  %v87_v30 = vrot.slane %v86_v24, 2 }
   0xf   :  { %v95_v31 = vadd.f32 %v94_v27, %v93_v21  ;;  %v101_v32 = vrot.slane %v100_v28, 2 }
  0x10   :  { %v82_v33 = vrot.slane %v81_v29, 1  ;;  %v88_v34 = vadd.f32 %v87_v30, %v86_v24 }
  0x11   :  { %v96_v37 = vrot.slane %v95_v31, 1  ;;  %v102_v38 = vadd.f32 %v101_v32, %v100_v28 }
  0x12   :  { %v83_v39 = vadd.f32 %v82_v33, %v81_v29  ;;  %v89_v40 = vrot.slane %v88_v34, 1 }
  0x13   :  { %v97_v41 = vadd.f32 %v96_v37, %v95_v31  ;;  %v103_v42 = vrot.slane %v102_v38, 1 }
  0x14   :  { %v90_v43 = vadd.f32 %v89_v40, %v88_v34 }
  0x15   :  { %v104_v45 = vadd.f32 %v103_v42, %v102_v38 }
  0x16   :  { %v109_v46 = vcombine.low %v83_v39, %v90_v43 }
  0x17   :  { %v110_v47 = vcombine.low %v97_v41, %v104_v45 }
  0x18   :  { %v117_v48 = vrot.slane %v109_v46, %v116_v44 }
  0x19   :  { %v124_v49 = vrot.slane %v110_v47, %v116_v44 }
  0x1b   :  { %v125_v50 = vcombine.low %v117_v48, %v124_v49 }
  0x1d   :  { %v132_v52 = vrot.slane %v125_v50, %v116_v44 }
  0x1f   :  { %v134_v53 = vadd.f32 %v132_v52, %v69_v51 }
  0x21   :  { %139 = vst.msk [vmem:[#allocation2] sm:$0xf] %vm270_vm0, %v134_v53 }
  0x28   :  { %v143_v58 = vld [vmem:[#allocation2] sm:$0xf] }
  0x29   :  { %v148_v59 = vrot.slane %v143_v58, %v147_v54  ;;  %v152_v60 = vrot.slane %v143_v58, %v151_v55  ;;  %v156_v61 = vrot.slane %v143_v58, %v155_v56  ;;  %v160_v62 = vrot.slane %v143_v58, %v159_v57 }
  0x2b   :  { %v166_v63 = vsel %vm165_vm2, %v148_v59, 0.0  ;;  %v167_v0 = vsel %vm165_vm2, %v152_v60, 0.0  ;;  %v169_v1 = vsel %vm165_vm2, %v156_v61, 0.0  ;;  %v171_v3 = vsel %vm165_vm2, %v160_v62, 0.0 }
  0x2c   :  { %v168_v2 = vadd.f32 %v167_v0, %v166_v63 }
  0x2e   :  { %v170_v4 = vadd.f32 %v169_v1, %v168_v2 }
  0x30   :  { %v172_v5 = vadd.f32 %v171_v3, %v170_v4 }
  0x32   :  { %173 = vadd.xlane.f32.xlu0 %v172_v5 }
  0xbf   :  { %v174_v6 = vpop.xlane.xlu0 %173 }
  0xc0   :  { %v175_v7 = vrot.slane %v174_v6, 4 }
  0xc2   :  { %v176_v8 = vadd.f32 %v175_v7, %v174_v6 }
  0xc4   :  { %v177_v9 = vrot.slane %v176_v8, 2 }
  0xc6   :  { %v178_v10 = vadd.f32 %v177_v9, %v176_v8 }
  0xc8   :  { %v179_v11 = vrot.slane %v178_v10, 1 }
  0xca   :  { %v180_v12 = vadd.f32 %v179_v11, %v178_v10 }
  0xcc   :  { %211 = vpush %v180_v12 }
  0xfd   :  { %s212_s17 = spop %211 }
  0xfe   :  { %v182_v13 = vstv %s212_s17 }
  0xff   :  { %184 = vst.msk [vmem:[#allocation3] sm:$0x1] %vm183_vm3, %v182_v13 }
 0x100   :  { %227 = shalt.err (!%p224_p4)
}
 0x101   :  { %s228_s22 = scalar_lea.hbm %s292_s2, 16 }
 0x102   :  { %p229_p5 = scmp.ne.s32.totalorder %s292_s2, %s228_s22  ;;  %p232_p6 = scmp.lt.u32.totalorder %s228_s22, %s292_s2 }
 0x104   :  { %p234_p7 = pnand %p232_p6, %p229_p5 }
 0x106   :  { %237 = shalt.err (!%p234_p7)
}
 0x107   :  { %194 = dma.vmem_to_hbm [thread:$0]  %s192_s1, 16, %s292_s2, [#allocation4]  }
 0x108   :  { %238 = dma.done.wait [#allocation4], 16  }
 0x109   :  { %239 = vsyncadd [#allocation4], 4294967280 }
 0x10a   :  { %198 = vsyncpa [#allocation4], 1 }

</bundles_post_ra>
